<compile_context>
chip_gen: v6e
topology: v6e:2x2x1
jax: 0.10.0
libtpu: 0.0.40
codegen_flags: <defaults>
</compile_context>

<pallas_src>
import math

import jax
import jax.numpy as jnp
import numpy as np
from jax.experimental import pallas as pl
from jax.experimental.pallas import tpu as pltpu

D_MODEL = 32  # embed dim (must be even)


# ----------------------------- kernel body ---------------------------------


def _pe_kernel(pos_ref, out_ref):
    """pos_ref: (A, 1, C) f32 positions; out_ref: (A, D, C) positional encoding."""
    D = out_ref.shape[1]
    # Per-feature constants, built in-kernel from an iota (tiny: D elements).
    #   inv_freq[d] = exp(-(2*(d//2)) * ln(10000) / D)
    #   phase[d]    = (d % 2) * pi/2        (cos(x) == sin(x + pi/2))
    d = jax.lax.broadcasted_iota(jnp.int32, (1, D, 1), 1)
    odd = d % 2
    inv_freq = jnp.exp((d - odd).astype(jnp.float32) * (-math.log(10000.0) / D))
    phase = odd.astype(jnp.float32) * (math.pi / 2.0)
    angle = pos_ref[...] * inv_freq + phase            # (A, D, C), one VPU pass
    # TODO(synk): verify via bundle dump whether sin is a single EUP push or a
    # VPU polynomial; either way this is the only transcendental per element.
    out_ref[...] = jnp.sin(angle).astype(out_ref.dtype)


# --------------------------- tiling / launch --------------------------------


def _vmem_capacity_bytes():
    try:
        return int(pltpu.get_tpu_info().vmem_capacity_bytes)
    except Exception:
        return 64 << 20  # v7x per-TensorCore VMEM — smallest current generation


def _largest_divisor_leq(n, cap):
    cap = int(max(1, min(cap, n)))
    for t in range(cap, 0, -1):
        if n % t == 0:
            return t
    return 1


def _pick_seq_tile(S_pad, bytes_per_seq_elem, vmem_cap, unit=128):
    """Largest multiple of `unit` dividing S_pad with ~<=4 MiB output blocks and
    a double-buffered footprint well inside VMEM."""
    cap_bytes = min(4 << 20, vmem_cap // 4)
    tile = (cap_bytes // max(1, bytes_per_seq_elem)) // unit * unit
    tile = int(max(unit, min(tile, S_pad)))
    while S_pad % tile:
        tile -= unit
    # v7x has 2 TensorCores: prefer >= 2 "parallel" grid steps when divisible.
    if S_pad // tile < 2 and (S_pad // 2) % unit == 0 and S_pad // 2 >= unit:
        tile = S_pad // 2
    return tile


def _pe_pallas(pos3, d_model, out_dtype, tile, tile_axis, vmem_cap):
    """pos3: (A, 1, C) f32. Returns (A, d_model, C) sinusoidal PE.

    tile_axis=0 tiles the leading axis (lanes = C = batch);
    tile_axis=2 tiles the trailing axis (lanes = C = sequence)."""
    A, one, C = pos3.shape
    assert one == 1
    itemsize = jnp.dtype(out_dtype).itemsize
    if tile_axis == 0:
        grid = (A // tile,)
        in_spec = pl.BlockSpec((tile, 1, C), lambda i: (i, 0, 0))
        out_spec = pl.BlockSpec((tile, d_model, C), lambda i: (i, 0, 0))
        out_block_bytes = tile * d_model * C * itemsize
        in_block_bytes = tile * C * 4
    else:
        grid = (C // tile,)
        in_spec = pl.BlockSpec((A, 1, tile), lambda i: (0, 0, i))
        out_spec = pl.BlockSpec((A, d_model, tile), lambda i: (0, 0, i))
        out_block_bytes = A * d_model * tile * itemsize
        in_block_bytes = A * tile * 4

    # Raise the scoped-VMEM limit only when the double-buffered footprint would
    # exceed v5e's 16 MiB default; bound it by the actual chip capacity (v7x:
    # 64 MiB physical, 32 MiB scoped default).
    need = 2 * (out_block_bytes + in_block_bytes) + (2 << 20)
    vmem_limit = None
    if need > (12 << 20):
        vmem_limit = int(min(max(need + (4 << 20), 32 << 20), vmem_cap - (4 << 20)))
        vmem_limit = max(vmem_limit, need)

    return pl.pallas_call(
        _pe_kernel,
        out_shape=jax.ShapeDtypeStruct((A, d_model, C), out_dtype),
        grid_spec=pltpu.PrefetchScalarGridSpec(
            num_scalar_prefetch=0,
            grid=grid,
            in_specs=[in_spec],
            out_specs=out_spec,
        ),
        compiler_params=pltpu.CompilerParams(
            dimension_semantics=("parallel",),
            vmem_limit_bytes=vmem_limit,
        ),
    )(pos3)


def _pe_bds_padded(x, d_model, out_dtype, vmem_cap):
    """General-B path: lanes = sequence. Returns ((B, d_model, S_pad), S_pad)."""
    S, B = x.shape
    S_pad = ((S + 127) // 128) * 128
    itemsize = jnp.dtype(out_dtype).itemsize
    bytes_per_s = B * (d_model * itemsize + 4)  # out + in bytes per seq element
    tile = _pick_seq_tile(S_pad, bytes_per_s, vmem_cap, unit=128)
    # Pre-shape positions to (B, 1, S_pad) in the wrapper (tiny) so the kernel
    # does no in-kernel reshape (not a view -> would materialize a VMEM copy).
    pos3 = jnp.zeros((B, 1, S_pad), jnp.float32).at[:, 0, :S].set(
        x.T.astype(jnp.float32))
    out = _pe_pallas(pos3, d_model, out_dtype, tile, tile_axis=2, vmem_cap=vmem_cap)
    return out, S_pad


# ------------------------------ public API ----------------------------------


def _pe_jnp(x, d_model, out_dtype):
    """Pure-jnp fallback for tiny shapes (padding + launch overhead dominates)."""
    S, B = x.shape
    pos = x.astype(jnp.float32)                                   # [S, B]
    i2 = jnp.arange(0, d_model, 2, dtype=jnp.float32)
    div = jnp.exp(i2 * (-math.log(10000.0) / d_model))            # [D/2]
    ang = pos[:, None, :] * div[None, :, None]                    # [S, D/2, B]
    pe = jnp.stack([jnp.sin(ang), jnp.cos(ang)], axis=2)          # [S, D/2, 2, B]
    return pe.reshape(S, d_model, B).astype(out_dtype)            # [S, D, B]


def position_embedding_fixed_bds(x, d_model=D_MODEL, *, out_dtype=jnp.float32):
    """x: [S, B] positions -> [B, d_model, S] (no output transpose).

    Preferred entry point for consumers that do not require the PyTorch
    [S, d_model, B] layout — avoids the extra HBM round-trip of a transpose."""
    assert d_model % 2 == 0, "d_model must be even"
    S, _ = x.shape
    out, _ = _pe_bds_padded(x, d_model, out_dtype, _vmem_capacity_bytes())
    return out[:, :, :S]


def position_embedding_fixed(x, d_model=D_MODEL, *, out_dtype=jnp.float32,
                             use_pallas=None):
    """x: [S, B] float positions -> [S, d_model, B] (PyTorch layout).

    use_pallas: True forces the Pallas kernel, False forces the jnp fallback,
    None auto-selects (tiny problems go to jnp)."""
    assert d_model % 2 == 0, "d_model must be even"
    S, B = x.shape
    if use_pallas is None:
        use_pallas = S * B * d_model >= (1 << 15)
    if not use_pallas:
        return _pe_jnp(x, d_model, out_dtype)

    vmem_cap = _vmem_capacity_bytes()
    itemsize = jnp.dtype(out_dtype).itemsize

    if B % 128 == 0:
        # Batch on lanes: kernel writes [S, d_model, B] directly with unmasked
        # lane-dense stores -> no output transpose, no sequence padding, no slice.
        bytes_per_s = B * (d_model * itemsize + 4)
        tile = _largest_divisor_leq(S, max(1, (4 << 20) // bytes_per_s))
        if S // tile < 2:  # give both v7x TensorCores a grid step when possible
            t2 = _largest_divisor_leq(S, max(1, S // 2))
            if t2 >= 8:
                tile = t2
        pos3 = x.astype(jnp.float32).reshape(S, 1, B)
        return _pe_pallas(pos3, d_model, out_dtype, tile, tile_axis=0,
                          vmem_cap=vmem_cap)

    # General/small B: lanes = sequence (lane-dense stores); the PyTorch
    # [S, d_model, B] contract then costs one transpose. Consumers that can take
    # [B, d_model, S] should use position_embedding_fixed_bds() and skip it.
    out_bds, _ = _pe_bds_padded(x, d_model, out_dtype, vmem_cap)
    return jnp.transpose(out_bds[:, :, :S], (2, 1, 0))
    # TODO(synk): nn.Dropout(p=0.1) is identity in eval mode; training-mode
    # stochastic dropout (pltpu.prng_seed + prng_random_bits) is not implemented.


# ------------------------------ reference -----------------------------------


def _numpy_reference(x, d_model):
    S, B = x.shape
    pos = np.asarray(x).T[:, :, None]                                  # [B, S, 1]
    div = np.exp(np.arange(0, d_model, 2, dtype=np.float32)
                 * (-math.log(10000.0) / d_model))                     # [D/2]
    pe = np.zeros((B, S, d_model), dtype=np.float32)
    pe[:, :, 0::2] = np.sin(pos * div)
    pe[:, :, 1::2] = np.cos(pos * div)
    return np.transpose(pe, (1, 2, 0))                                 # [S, D, B]


if __name__ == "__main__":
    key = jax.random.PRNGKey(0)

    # --- general-B path (lanes = sequence), PyTorch layout [S, d_model, B] ---
    S, B = 8, 2
    x = jax.random.uniform(key, (S, B), dtype=jnp.float32) * 10.0
    out = position_embedding_fixed(x, D_MODEL, use_pallas=True)
    out = jax.block_until_ready(out)
    ref = _numpy_reference(x, D_MODEL)
    assert out.shape == (S, D_MODEL, B)
    np.testing.assert_allclose(np.asarray(out), ref, rtol=1e-5, atol=1e-5)

    # --- no-transpose consumer layout [B, d_model, S] ---
    out_bds = jax.block_until_ready(position_embedding_fixed_bds(x, D_MODEL))
    np.testing.assert_allclose(np.asarray(out_bds),
                               np.transpose(ref, (2, 1, 0)),
                               rtol=1e-5, atol=1e-5)

    # --- batch-on-lanes path (B % 128 == 0): direct [S, d_model, B] output ---
    S2, B2 = 8, 128
    x2 = jax.random.uniform(jax.random.PRNGKey(1), (S2, B2), dtype=jnp.float32) * 10.0
    out2 = jax.block_until_ready(
        position_embedding_fixed(x2, D_MODEL, use_pallas=True))
    assert out2.shape == (S2, D_MODEL, B2)
    np.testing.assert_allclose(np.asarray(out2), _numpy_reference(x2, D_MODEL),
                               rtol=1e-5, atol=1e-5)

    print("KERNEL_OK")
</pallas_src>

<mosaic_0001>
module attributes {stable_mosaic.version = 11 : i64} {
  func.func @_pe_kernel(%arg0: i32, %arg1: memref<2x1x128xf32, #tpu.memory_space<vmem>>, %arg2: memref<2x32x128xf32, #tpu.memory_space<vmem>>) attributes {dimension_semantics = [#tpu.dimension_semantics<parallel>], iteration_bounds = array<i64: 1>, scalar_prefetch = 0 : i64, scratch_operands = 0 : i64, tpu.core_type = #tpu.core_type<tc>, window_params = [{transform_indices = @transform_0, window_bounds = array<i64: 2, 1, 128>}, {transform_indices = @transform_1, window_bounds = array<i64: 2, 32, 128>}]} {
    %0 = tpu.iota {dimensions = array<i32: 1>} : vector<1x32x1xi32>
    %c2_i32 = arith.constant 2 : i32
    %c0_i32 = arith.constant 0 : i32
    %1 = arith.cmpi eq, %c2_i32, %c0_i32 : i32
    %c1_i32 = arith.constant 1 : i32
    %2 = arith.select %1, %c1_i32, %c2_i32 : i32
    %3 = vector.broadcast %2 : i32 to vector<1x32x1xi32>
    %4 = arith.remsi %0, %3 : vector<1x32x1xi32>
    %c0_i32_0 = arith.constant 0 : i32
    %5 = vector.broadcast %c0_i32_0 : i32 to vector<1x32x1xi32>
    %6 = arith.cmpi ne, %4, %5 : vector<1x32x1xi32>
    %c0_i32_1 = arith.constant 0 : i32
    %7 = vector.broadcast %c0_i32_1 : i32 to vector<1x32x1xi32>
    %8 = arith.cmpi slt, %4, %7 : vector<1x32x1xi32>
    %c0_i32_2 = arith.constant 0 : i32
    %9 = arith.cmpi slt, %2, %c0_i32_2 : i32
    %10 = vector.broadcast %9 : i1 to vector<1x32x1xi1>
    %11 = vector.broadcast %10 : vector<1x32x1xi1> to vector<1x32x1xi1>
    %12 = arith.xori %8, %11 : vector<1x32x1xi1>
    %13 = arith.andi %12, %6 : vector<1x32x1xi1>
    %14 = vector.broadcast %2 : i32 to vector<1x32x1xi32>
    %15 = arith.addi %4, %14 : vector<1x32x1xi32>
    %16 = arith.select %13, %15, %4 : vector<1x32x1xi1>, vector<1x32x1xi32>
    %17 = arith.subi %0, %16 : vector<1x32x1xi32>
    %18 = arith.sitofp %17 : vector<1x32x1xi32> to vector<1x32x1xf32>
    %cst = arith.constant -0.287823141 : f32
    %19 = vector.broadcast %cst : f32 to vector<1x32x1xf32>
    %20 = arith.mulf %18, %19 : vector<1x32x1xf32>
    %21 = math.exp %20 : vector<1x32x1xf32>
    %22 = arith.sitofp %16 : vector<1x32x1xi32> to vector<1x32x1xf32>
    %cst_3 = arith.constant 1.57079637 : f32
    %23 = vector.broadcast %cst_3 : f32 to vector<1x32x1xf32>
    %24 = arith.mulf %22, %23 : vector<1x32x1xf32>
    %c0 = arith.constant 0 : index
    %c0_4 = arith.constant 0 : index
    %c0_5 = arith.constant 0 : index
    %25 = vector.load %arg1[%c0, %c0_4, %c0_5] : memref<2x1x128xf32, #tpu.memory_space<vmem>>, vector<2x1x128xf32>
    %26 = vector.broadcast %25 : vector<2x1x128xf32> to vector<2x32x128xf32>
    %27 = vector.broadcast %21 : vector<1x32x1xf32> to vector<2x32x128xf32>
    %28 = arith.mulf %26, %27 : vector<2x32x128xf32>
    %29 = vector.broadcast %24 : vector<1x32x1xf32> to vector<2x32x128xf32>
    %30 = arith.addf %28, %29 : vector<2x32x128xf32>
    %31 = math.sin %30 : vector<2x32x128xf32>
    %c0_6 = arith.constant 0 : index
    %c0_7 = arith.constant 0 : index
    %c0_8 = arith.constant 0 : index
    %32 = vector.load %arg2[%c0_6, %c0_7, %c0_8] : memref<2x32x128xf32, #tpu.memory_space<vmem>>, vector<2x32x128xf32>
    tpu.vector_store %arg2[%c0_6, %c0_7, %c0_8], %31 {strides = array<i32>} : memref<2x32x128xf32, #tpu.memory_space<vmem>>, vector<2x32x128xf32>,
    return
  }
  func.func @transform_0(%arg0: i32) -> (i32, i32, i32) {
    %c0_i32 = arith.constant 0 : i32
    %c0_i32_0 = arith.constant 0 : i32
    %c0_i32_1 = arith.constant 0 : i32
    return %c0_i32, %c0_i32_0, %arg0 : i32, i32, i32
  }
  func.func @transform_1(%arg0: i32) -> (i32, i32, i32) {
    %c0_i32 = arith.constant 0 : i32
    %c0_i32_0 = arith.constant 0 : i32
    %c0_i32_1 = arith.constant 0 : i32
    return %c0_i32, %c0_i32_0, %arg0 : i32, i32, i32
  }
}

</mosaic_0001>

<bundles_post_ra>
// kernel: tpu_custom_call.1
= control target key start
LH: loop header
LB: loop body
LE: loop exit
PB: predicated region body
PF: predicated region fallthrough
CT: control target
= control target key end

     0   :  { %6 = vsyncpa [#allocation3], 0  ;;  %s1742_s0 = inlined_call_operand.hbm [shape: f32[2,1,128], index: 0, kind: input, shape index: {}]   ;;  %s1743_s1 = inlined_call_operand.hbm [shape: f32[2,32,128], index: 1, kind: output, shape index: {}]  }
   0x1   :  { %7 = vsyncpa [#allocation4], 0  ;;  %s1153_s6 = smov [#allocation2]  }
   0x2   :  { %s13_s7 = sshll.u32 %s1153_s6, 4  ;;  %s14_s7 = int_to_ptr.vmem [resolvable:$true] %s13_s7 }
   0x3   :  { %s1117_s8 = scalar_lea.vmem %s14_s7, 32  ;;  %p1122_p1 = scmp.lt.s32.totalorder %s14_s7, %s14_s7 }
   0x4   :  { %p1118_p0 = scmp.ne.s32.totalorder %s14_s7, %s1117_s8  ;;  %p1123_p2 = scmp.lt.s32.totalorder %s1117_s8, %s1117_s8 }
   0x6   :  { %p1124_p3 = por %p1123_p2, %p1122_p1 }
   0x8   :  { %p1125_p4 = pnand %p1124_p3, %p1118_p0 }
   0xa   :  { %1128 = shalt.err (!%p1125_p4)
}
   0xb   :  { %s1154_s9 = smov 16   ;;  %s1155_s10 = smov 1  }
   0xc   :  { %19 = dma.hbm_to_vmem [thread:$0]  %s1742_s0, 32, %s14_s7, [#allocation3], %s1154_s9, %s1154_s9, %s1155_s10  }
   0xd   :  { %1149 = dma.done.wait [#allocation3], 32  }
   0xe   :  { %1150 = vsyncadd [#allocation3], 4294967264  ;;  %v23_v0 = vlaneseq  ;;  %v991_v29 = vld [vmem:[#allocation2] ss:$0 sm:$0xff]  ;;  %v992_v30 = vld [vmem:[#allocation2 + $0x1] ss:$0 sm:$0xff] }
   0xf   :  { %s1162_s0 = smov [#allocation5]  }
  0x10   :  { %v24_v1 = vshrl.u32 %v23_v0, 7  ;;  %s979_s13 = sshll.u32 %s1162_s0, 4  ;;  %s980_s13 = int_to_ptr.vmem [resolvable:$true] %s979_s13 }
  0x11   :  { %s1129_s14 = scalar_lea.vmem %s980_s13, 1024  ;;  %p1134_p6 = scmp.lt.s32.totalorder %s980_s13, %s980_s13 }
  0x12   :  { %v25_v2 = vadd.s32 8, %v24_v1  ;;  %v26_v3 = vadd.s32 16, %v24_v1  ;;  %v27_v4 = vadd.s32 24, %v24_v1  ;;  %v32_v5 = vand.u32 1, %v24_v1  ;;  %p1130_p5 = scmp.ne.s32.totalorder %s980_s13, %s1129_s14  ;;  %p1135_p7 = scmp.lt.s32.totalorder %s1129_s14, %s1129_s14 }
  0x14   :  { %v39_v6 = vand.u32 1, %v25_v2  ;;  %v46_v7 = vand.u32 1, %v26_v3  ;;  %v53_v8 = vand.u32 1, %v27_v4  ;;  %v76_v9 = vsub.s32 %v24_v1, %v32_v5  ;;  %p1136_p8 = por %p1135_p7, %p1134_p6 }
  0x15   :  { %v96_v25 = vcvt.s32.f32 %v32_v5 }
  0x16   :  { %v77_v10 = vsub.s32 %v25_v2, %v39_v6  ;;  %v78_v11 = vsub.s32 %v26_v3, %v46_v7  ;;  %v79_v12 = vsub.s32 %v27_v4, %v53_v8  ;;  %v80_v13 = vcvt.s32.f32 %v76_v9  ;;  %p1137_p9 = pnand %p1136_p8, %p1130_p5 }
  0x17   :  { %v97_v26 = vcvt.s32.f32 %v39_v6  ;;  %v98_v27 = vcvt.s32.f32 %v46_v7  ;;  %v99_v28 = vcvt.s32.f32 %v53_v8  ;;  %v100_v31 = vmul.f32 1.5707964, %v96_v25 }
  0x18   :  { %v81_v14 = vcvt.s32.f32 %v77_v10  ;;  %v82_v15 = vcvt.s32.f32 %v78_v11  ;;  %v83_v16 = vcvt.s32.f32 %v79_v12  ;;  %v84_v17 = vmul.f32 -0.28782314, %v80_v13 }
  0x19   :  { %v101_v33 = vmul.f32 1.5707964, %v97_v26  ;;  %v102_v35 = vmul.f32 1.5707964, %v98_v27  ;;  %v103_v39 = vmul.f32 1.5707964, %v99_v28 }
  0x1a   :  { %v85_v18 = vmul.f32 -0.28782314, %v81_v14  ;;  %v86_v19 = vmul.f32 -0.28782314, %v82_v15  ;;  %v87_v20 = vmul.f32 -0.28782314, %v83_v16 }
  0x1b   :  { %v88_v21 = vmul.f32 1.442695, %v84_v17  ;;  %v1156_v16 = vmov 683565275  }
  0x1c   :  { %v90_v22 = vmul.f32 1.442695, %v85_v18  ;;  %v92_v23 = vmul.f32 1.442695, %v86_v19  ;;  %v94_v24 = vmul.f32 1.442695, %v87_v20 }
  0x1d   :  { %1069 = vpow2.f32 %v88_v21  ;;  %v1157_v18 = vmov 2475754826   ;;  %v1158_v20 = vmov 2131351028  }
  0x1e   :  { %1071 = vpow2.f32 %v90_v22  ;;  %v1159_v22 = vmov 2102212464  }
  0x1f   :  { %1073 = vpow2.f32 %v92_v23 }
  0x20   :  { %1075 = vpow2.f32 %v94_v24  ;;  %v1160_v24 = vmov 920167782  }
  0x2a   :  { %v1070_v32 = vpop.eup %1069 }
  0x2b   :  { %v1072_v34 = vpop.eup %1071  ;;  %v118_v36 = vmul.f32 %v1070_v32, %v991_v29  ;;  %v122_v37 = vmul.f32 %v1070_v32, %v992_v30  ;;  %v1161_v32 = vmov 1326507024  }
  0x2c   :  { %v1074_v38 = vpop.eup %1073  ;;  %v119_v40 = vmul.f32 %v1072_v34, %v991_v29  ;;  %v123_v41 = vmul.f32 %v1072_v34, %v992_v30 }
  0x2d   :  { %v1076_v42 = vpop.eup %1075  ;;  %v120_v43 = vmul.f32 %v1074_v38, %v991_v29  ;;  %v124_v44 = vmul.f32 %v1074_v38, %v992_v30  ;;  %v1178_v45 = vadd.f32 %v118_v36, %v100_v31  ;;  %v1180_v46 = vadd.f32 %v122_v37, %v100_v31 }
  0x2e   :  { %v125_v47 = vmul.f32 %v1076_v42, %v992_v30  ;;  %v1182_v48 = vadd.f32 %v119_v40, %v101_v33  ;;  %v1184_v49 = vadd.f32 %v123_v41, %v101_v33  ;;  %v121_v63 = vmul.f32 %v1076_v42, %v991_v29 }
  0x2f   :  { %v1186_v50 = vadd.f32 %v124_v44, %v102_v35  ;;  %v134_v51 = vand.u32 2147483647, %v1178_v45  ;;  %v1189_v52 = vadd.f32 %v120_v43, %v102_v35  ;;  %v137_v54 = vand.u32 2139095040, %v1178_v45 }
  0x30   :  { %v1191_v53 = vadd.f32 %v125_v47, %v103_v39  ;;  %v238_v55 = vand.u32 2147483647, %v1182_v48  ;;  %v241_v57 = vand.u32 2139095040, %v1182_v48  ;;  %v1201_v8 = vadd.f32 %v121_v63, %v103_v39 }
  0x31   :  { %v138_v56 = vshrl.u32 %v137_v54, 23  ;;  %v141_v58 = vand.u32 8388607, %v134_v51  ;;  %v345_v62 = vand.u32 2139095040, %v1189_v52  ;;  %v342_v13 = vand.u32 2147483647, %v1189_v52 }
  0x32   :  { %v245_v59 = vand.u32 8388607, %v238_v55  ;;  %v242_v61 = vshrl.u32 %v241_v57, 23  ;;  %vm136_vm13 = vcmp.lt.s32.totalorder %v1178_v45, 0  ;;  %vm1315_vm15 = vcmp.le.f32.partialorder %v134_v51, 0.7853982 }
  0x33   :  { %v993_v60 = vadd.s32 4294967169, %v138_v56  ;;  %v346_v2 = vshrl.u32 %v345_v62, 23  ;;  %v142_v3 = vor.u32 8388608, %v141_v58 }
  0x34   :  { %v997_v1 = vadd.s32 4294967169, %v242_v61  ;;  %v246_v4 = vor.u32 8388608, %v245_v59 }
  0x35   :  { %v144_v0 = vadd.s32 1, %v993_v60  ;;  %v1001_v6 = vadd.s32 4294967169, %v346_v2  ;;  %v1203_v11 = vshll.u32 %v142_v3, 8 }
  0x36   :  { %v248_v5 = vadd.s32 1, %v997_v1  ;;  %v1205_v12 = vshll.u32 %v246_v4, 8 }
  0x37   :  { %vm145_vm0 = vcmp.gt.s32.totalorder %v144_v0, 0  ;;  %v1208_v14 = vadd.s32 1, %v1001_v6 }
  0x38   :  { %v146_v7 = vsel %vm145_vm0, %v144_v0, 0  ;;  %vm249_vm1 = vcmp.gt.s32.totalorder %v248_v5, 0 }
  0x39   :  { %v147_v9 = vshrl.u32 %v146_v7, 5  ;;  %v148_v10 = vand.u32 31, %v146_v7  ;;  %v250_v26 = vsel %vm249_vm1, %v248_v5, 0  ;;  %vm353_vm8 = vcmp.gt.s32.totalorder %v1208_v14, 0 }
  0x3a   :  { %v251_v39 = vshrl.u32 %v250_v26, 5  ;;  %v252_v40 = vand.u32 31, %v250_v26 }
  0x3b   :  { %v149_v15 = vsub.s32 32, %v148_v10  ;;  %v151_v17 = vshll.u32 %v1156_v16, %v148_v10  ;;  %v154_v19 = vshll.u32 %v1157_v18, %v148_v10  ;;  %v157_v21 = vshll.u32 %v1158_v20, %v148_v10 }
  0x3c   :  { %v160_v23 = vshll.u32 %v1159_v22, %v148_v10  ;;  %v163_v25 = vshll.u32 %v1160_v24, %v148_v10  ;;  %vm166_vm2 = vcmp.lt.s32.totalorder %v147_v9, 1  ;;  %vm167_vm3 = vcmp.lt.s32.totalorder %v147_v9, 2 }
  0x3d   :  { %v150_v27 = vshrl.u32 %v1156_v16, %v149_v15  ;;  %v152_v28 = vshrl.u32 %v1157_v18, %v149_v15  ;;  %v155_v29 = vshrl.u32 %v1158_v20, %v149_v15  ;;  %v158_v30 = vshrl.u32 %v1159_v22, %v149_v15 }
  0x3e   :  { %v161_v31 = vshrl.u32 %v1160_v24, %v149_v15  ;;  %v164_v33 = vshrl.u32 %v1161_v32, %v149_v15  ;;  %vm168_vm4 = vcmp.lt.s32.totalorder %v147_v9, 3  ;;  %vm169_vm5 = vcmp.lt.s32.totalorder %v147_v9, 4 }
  0x3f   :  { %v153_v34 = vor.u32 %v152_v28, %v151_v17  ;;  %v156_v35 = vor.u32 %v155_v29, %v154_v19  ;;  %v159_v36 = vor.u32 %v158_v30, %v157_v21  ;;  %v253_v57 = vsub.s32 32, %v252_v40 }
  0x40   :  { %v162_v37 = vor.u32 %v161_v31, %v160_v23  ;;  %v165_v38 = vor.u32 %v164_v33, %v163_v25  ;;  %v255_v61 = vshll.u32 %v1156_v16, %v252_v40  ;;  %v258_v7 = vshll.u32 %v1157_v18, %v252_v40 }
  0x41   :  { %v170_v41 = vsel %vm166_vm2, %v150_v27, %v153_v34  ;;  %v171_v42 = vsel %vm169_vm5, %v159_v36, 2102212464  ;;  %v174_v43 = vsel %vm166_vm2, %v153_v34, %v156_v35  ;;  %v178_v44 = vsel %vm166_vm2, %v156_v35, %v159_v36 }
  0x42   :  { %v172_v47 = vsel %vm168_vm4, %v156_v35, %v171_v42  ;;  %v175_v54 = vsel %vm169_vm5, %v162_v37, 920167782  ;;  %v179_v56 = vsel %vm169_vm5, %v165_v38, 1326507024  ;;  %v254_v1 = vshrl.u32 %v1156_v16, %v253_v57 }
  0x43   :  { %v173_v58 = vsel %vm167_vm3, %v170_v41, %v172_v47  ;;  %v176_v59 = vsel %vm168_vm4, %v159_v36, %v175_v54  ;;  %v180_v60 = vsel %vm168_vm4, %v162_v37, %v179_v56  ;;  %v256_v6 = vshrl.u32 %v1157_v18, %v253_v57 }
  0x44   :  { %v177_v62 = vsel %vm167_vm3, %v174_v43, %v176_v59  ;;  %v181_v63 = vsel %vm167_vm3, %v178_v44, %v180_v60  ;;  %v189_v0 = vmul.u32 %v1203_v11, %v173_v58  ;;  %v259_v9 = vshrl.u32 %v1158_v20, %v253_v57 }
  0x45   :  { %v1235_v2 = vmul.u32.u64.low %v1203_v11, %v181_v63  ;;  %v1236_v3 = vmul.u32.u64.high %v1203_v11, %v181_v63, %v1235_v2  ;;  %v1239_v4 = vmul.u32.u64.low %v1203_v11, %v177_v62  ;;  %v1240_v5 = vmul.u32.u64.high %v1203_v11, %v177_v62, %v1239_v4 }
  0x46   :  { %v261_v10 = vshll.u32 %v1158_v20, %v252_v40  ;;  %v262_v15 = vshrl.u32 %v1159_v22, %v253_v57  ;;  %v264_v17 = vshll.u32 %v1159_v22, %v252_v40  ;;  %v265_v19 = vshrl.u32 %v1160_v24, %v253_v57 }
  0x47   :  { %v267_v21 = vshll.u32 %v1160_v24, %v252_v40  ;;  %v257_v23 = vor.u32 %v256_v6, %v255_v61  ;;  %v260_v11 = vor.u32 %v259_v9, %v258_v7  ;;  %v268_v25 = vshrl.u32 %v1161_v32, %v253_v57 }
  0x48   :  { %vm270_vm6 = vcmp.lt.s32.totalorder %v251_v39, 1  ;;  %vm191_vm7 = vc.u32 %v1236_v3, %v1239_v4  ;;  %v192_v26 = vadd.s32 1, %v1240_v5  ;;  %v263_v27 = vor.u32 %v262_v15, %v261_v10 }
  0x49   :  { %v266_v28 = vor.u32 %v265_v19, %v264_v17  ;;  %v269_v29 = vor.u32 %v268_v25, %v267_v21  ;;  %vm271_vm9 = vcmp.lt.s32.totalorder %v251_v39, 2  ;;  %vm272_vm10 = vcmp.lt.s32.totalorder %v251_v39, 3 }
  0x4a   :  { %v193_v30 = vsel %vm191_vm7, %v192_v26, %v1240_v5  ;;  %vm273_vm11 = vcmp.lt.s32.totalorder %v251_v39, 4  ;;  %v274_v31 = vsel %vm270_vm6, %v254_v1, %v257_v23  ;;  %v278_v33 = vsel %vm270_vm6, %v257_v23, %v260_v11 }
  0x4b   :  { %v194_v34 = vadd.s32 %v193_v30, %v189_v0  ;;  %v275_v35 = vsel %vm273_vm11, %v263_v27, 2102212464  ;;  %v279_v36 = vsel %vm273_vm11, %v266_v28, 920167782  ;;  %v282_v37 = vsel %vm270_vm6, %v260_v11, %v263_v27 }
  0x4c   :  { %v276_v38 = vsel %vm272_vm10, %v260_v11, %v275_v35  ;;  %v280_v40 = vsel %vm272_vm10, %v263_v27, %v279_v36  ;;  %v283_v41 = vsel %vm273_vm11, %v269_v29, 1326507024  ;;  %v349_v42 = vand.u32 8388607, %v342_v13 }
  0x4d   :  { %v195_v43 = vadd.s32 536870912, %v194_v34  ;;  %v281_v44 = vsel %vm271_vm9, %v278_v33, %v280_v40  ;;  %v284_v47 = vsel %vm272_vm10, %v266_v28, %v283_v41  ;;  %v354_v54 = vsel %vm353_vm8, %v1208_v14, 0 }
  0x4e   :  { %v277_v56 = vsel %vm271_vm9, %v274_v31, %v276_v38  ;;  %v285_v57 = vsel %vm271_vm9, %v282_v37, %v284_v47  ;;  %v1269_v58 = vmul.u32.u64.low %v1205_v12, %v281_v44  ;;  %v1270_v59 = vmul.u32.u64.high %v1205_v12, %v281_v44, %v1269_v58 }
  0x4f   :  { %v1273_v60 = vshrl.u32 %v195_v43, 30  ;;  %v1276_v61 = vmul.u32.u64.low %v1205_v12, %v285_v57  ;;  %v1277_v62 = vmul.u32.u64.high %v1205_v12, %v285_v57, %v1276_v61  ;;  %v449_v63 = vand.u32 2139095040, %v1201_v8 }
  0x50   :  { %v356_v0 = vand.u32 31, %v354_v54  ;;  %v446_v14 = vand.u32 2147483647, %v1201_v8  ;;  %v293_v39 = vmul.u32 %v1205_v12, %v277_v56  ;;  %v296_v2 = vadd.s32 1, %v1270_v59 }
  0x51   :  { %v197_v1 = vshll.u32 %v1273_v60, 30  ;;  %vm295_vm12 = vc.u32 %v1277_v62, %v1269_v58  ;;  %v350_v7 = vor.u32 8388608, %v349_v42  ;;  %v450_v9 = vshrl.u32 %v449_v63, 23 }
  0x52   :  { %v357_v5 = vsub.s32 32, %v356_v0  ;;  %v297_v10 = vsel %vm295_vm12, %v296_v2, %v1270_v59  ;;  %v359_v15 = vshll.u32 %v1156_v16, %v356_v0  ;;  %v362_v17 = vshll.u32 %v1157_v18, %v356_v0 }
  0x53   :  { %v1284_v6 = vsub.s32 %v194_v34, %v197_v1  ;;  %v1293_v19 = vand.u32 8388607, %v446_v14  ;;  %v298_v21 = vadd.s32 %v297_v10, %v293_v39  ;;  %v355_v25 = vshrl.u32 %v354_v54, 5 }
  0x54   :  { %v360_v23 = vshrl.u32 %v1157_v18, %v357_v5  ;;  %v363_v11 = vshrl.u32 %v1158_v20, %v357_v5  ;;  %v365_v26 = vshll.u32 %v1158_v20, %v356_v0  ;;  %v366_v27 = vshrl.u32 %v1159_v22, %v357_v5 }
  0x55   :  { %v200_v12 = vsub.s32 0, %v1284_v6  ;;  %v368_v28 = vshll.u32 %v1159_v22, %v356_v0  ;;  %v299_v30 = vadd.s32 536870912, %v298_v21  ;;  %v1303_v31 = vshll.u32 %v350_v7, 8 }
  0x56   :  { %v1005_v33 = vadd.s32 4294967169, %v450_v9  ;;  %v369_v34 = vshrl.u32 %v1160_v24, %v357_v5  ;;  %v371_v35 = vshll.u32 %v1160_v24, %v356_v0  ;;  %v372_v36 = vshrl.u32 %v1161_v32, %v357_v5 }
  0x57   :  { %v994_v29 = vmin.u32 %v200_v12, %v1284_v6  ;;  %v454_v37 = vor.u32 8388608, %v1293_v19  ;;  %v190_v38 = vadd.s32 %v1239_v4, %v1236_v3  ;;  %v361_v41 = vor.u32 %v360_v23, %v359_v15 }
  0x58   :  { %v364_v42 = vor.u32 %v363_v11, %v362_v17  ;;  %v1311_v43 = vshrl.u32 %v299_v30, 30  ;;  %v367_v44 = vor.u32 %v366_v27, %v365_v26  ;;  %v370_v47 = vor.u32 %v369_v34, %v368_v28 }
  0x59   :  { %v202_v40 = vclz %v994_v29  ;;  %vm374_vm14 = vcmp.lt.s32.totalorder %v355_v25, 1  ;;  %v220_v57 = vsub.s32 4, %v1273_v60  ;;  %vm376_vm0 = vcmp.lt.s32.totalorder %v355_v25, 3 }
  0x5a   :  { %vm377_vm1 = vcmp.lt.s32.totalorder %v355_v25, 4  ;;  %v301_v3 = vshll.u32 %v1311_v43, 30  ;;  %v358_v4 = vshrl.u32 %v1156_v16, %v357_v5  ;;  %v373_v59 = vor.u32 %v372_v36, %v371_v35 }
  0x5b   :  { %v995_v56 = vadd.s32 4294967294, %v202_v40  ;;  %v383_v61 = vsel %vm377_vm1, %v370_v47, 920167782  ;;  %vm375_vm3 = vcmp.lt.s32.totalorder %v355_v25, 2  ;;  %v382_v63 = vsel %vm374_vm14, %v361_v41, %v364_v42 }
  0x5c   :  { %v456_v51 = vadd.s32 1, %v1005_v33  ;;  %v1324_v1 = vsub.s32 %v298_v21, %v301_v3  ;;  %v379_v39 = vsel %vm377_vm1, %v367_v44, 2102212464  ;;  %v384_v2 = vsel %vm376_vm0, %v367_v44, %v383_v61 }
  0x5d   :  { %vm996_vm2 = vcmp.lt.s32.totalorder %v995_v56, 0  ;;  %v386_v5 = vsel %vm374_vm14, %v364_v42, %v367_v44  ;;  %v221_v15 = vsel %vm136_vm13, %v220_v57, %v1273_v60  ;;  %v378_v19 = vsel %vm374_vm14, %v358_v4, %v361_v41 }
  0x5e   :  { %v205_v0 = vsel %vm996_vm2, 0, %v995_v56  ;;  %v304_v17 = vsub.s32 0, %v1324_v1  ;;  %v387_v12 = vsel %vm377_vm1, %v373_v59, 1326507024  ;;  %v380_v11 = vsel %vm376_vm0, %v364_v42, %v379_v39 }
  0x5f   :  { %v206_v7 = vsub.s32 32, %v205_v0  ;;  %v207_v9 = vshll.u32 %v1284_v6, %v205_v0  ;;  %v210_v10 = vsub.s32 4294967266, %v205_v0  ;;  %v388_v26 = vsel %vm376_vm0, %v370_v47, %v387_v12 }
  0x60   :  { %v998_v6 = vmin.u32 %v304_v17, %v1324_v1  ;;  %v385_v27 = vsel %vm375_vm3, %v382_v63, %v384_v2  ;;  %v389_v28 = vsel %vm375_vm3, %v386_v5, %v388_v26  ;;  %vm457_vm4 = vcmp.gt.s32.totalorder %v456_v51, 0 }
  0x61   :  { %v208_v21 = vshrl.u32 %v190_v38, %v206_v7  ;;  %v211_v23 = vadd.s32 127, %v210_v10  ;;  %v1342_v30 = vmul.u32.u64.low %v1303_v31, %v389_v28  ;;  %v1343_v33 = vmul.u32.u64.high %v1303_v31, %v389_v28, %v1342_v30 }
  0x62   :  { %v223_v34 = vsel %vm1315_vm15, 0, %v221_v15  ;;  %v306_v35 = vclz %v998_v6  ;;  %v381_v36 = vsel %vm375_vm3, %v378_v19, %v380_v11  ;;  %vm240_vm5 = vcmp.lt.s32.totalorder %v1182_v48, 0 }
  0x63   :  { %v209_v60 = vor.u32 %v208_v21, %v207_v9  ;;  %v212_v29 = vshll.u32 %v211_v23, 23  ;;  %v1349_v41 = vmul.u32.u64.low %v1303_v31, %v385_v27  ;;  %v1350_v42 = vmul.u32.u64.high %v1303_v31, %v385_v27, %v1349_v41 }
  0x64   :  { %v999_v44 = vadd.s32 4294967294, %v306_v35  ;;  %v458_v47 = vsel %vm457_vm4, %v456_v51, 0  ;;  %v1354_v56 = vshll.u32 %v454_v37, 8  ;;  %v227_v3 = vadd.s32 3, %v223_v34 }
  0x65   :  { %v213_v38 = vor.u32 4788187, %v212_v29  ;;  %v216_v40 = vcvt.s32.f32 %v209_v60  ;;  %v294_v4 = vadd.s32 %v1269_v58, %v1277_v62  ;;  %v324_v25 = vsub.s32 4, %v1311_v43 }
  0x66   :  { %vm1361_vm6 = vcmp.le.f32.partialorder %v238_v55, 0.7853982  ;;  %vm1000_vm7 = vcmp.lt.s32.totalorder %v999_v44, 0  ;;  %v397_v61 = vmul.u32 %v1303_v31, %v381_v36  ;;  %vm399_vm8 = vc.u32 %v1343_v33, %v1349_v41 }
  0x67   :  { %v214_v57 = vand.u32 2147483647, %v213_v38  ;;  %v460_v37 = vand.u32 31, %v458_v47  ;;  %v309_v51 = vsel %vm1000_vm7, 0, %v999_v44  ;;  %v400_v0 = vadd.s32 1, %v1350_v42 }
  0x68   :  { %v550_v58 = vand.u32 2147483647, %v1180_v46  ;;  %v310_v62 = vsub.s32 32, %v309_v51  ;;  %v311_v39 = vshll.u32 %v1324_v1, %v309_v51  ;;  %v314_v55 = vsub.s32 4294967266, %v309_v51 }
  0x69   :  { %v217_v63 = vmul.f32 %v216_v40, %v214_v57  ;;  %v461_v2 = vsub.s32 32, %v460_v37  ;;  %v1371_v9 = vand.u32 3, %v227_v3  ;;  %v325_v31 = vsel %vm240_vm5, %v324_v25, %v1311_v43 }
  0x6a   :  { %v401_v10 = vsel %vm399_vm8, %v400_v0, %v1350_v42  ;;  %v312_v5 = vshrl.u32 %v294_v4, %v310_v62  ;;  %v315_v15 = vadd.s32 127, %v314_v55  ;;  %v1377_v19 = vshrl.u32 %v458_v47, 5 }
  0x6b   :  { %v218_v7 = vxor.u32 2147483648, %v217_v63  ;;  %v402_v17 = vadd.s32 %v401_v10, %v397_v61  ;;  %v463_v1 = vshll.u32 %v1156_v16, %v460_v37  ;;  %v464_v21 = vshrl.u32 %v1157_v18, %v461_v2 }
  0x6c   :  { %v466_v23 = vshll.u32 %v1157_v18, %v460_v37  ;;  %v313_v11 = vor.u32 %v312_v5, %v311_v39  ;;  %v316_v26 = vshll.u32 %v315_v15, 23  ;;  %v467_v27 = vshrl.u32 %v1158_v20, %v461_v2 }
  0x6d   :  { %v219_v12 = vsel %vm136_vm13, %v218_v7, %v217_v63  ;;  %v403_v6 = vadd.s32 536870912, %v402_v17  ;;  %v469_v28 = vshll.u32 %v1158_v20, %v460_v37  ;;  %v470_v60 = vshrl.u32 %v1159_v22, %v461_v2 }
  0x6e   :  { %v222_v43 = vsel %vm1315_vm15, %v1178_v45, %v219_v12  ;;  %v317_v29 = vor.u32 4788187, %v316_v26  ;;  %v320_v30 = vcvt.s32.f32 %v313_v11  ;;  %v327_v35 = vsel %vm1361_vm6, 0, %v325_v31 }
  0x6f   :  { %1077 = vcosq.f32 %v222_v43  ;;  %v404_v34 = vshrl.u32 %v403_v6, 30  ;;  %v472_v54 = vshll.u32 %v1159_v22, %v460_v37  ;;  %v473_v36 = vshrl.u32 %v1160_v24, %v461_v2 }
  0x70   :  { %1079 = vsinq.f32 %v222_v43  ;;  %v475_v38 = vshll.u32 %v1160_v24, %v460_v37  ;;  %v318_v40 = vand.u32 2147483647, %v317_v29  ;;  %v476_v44 = vshrl.u32 %v1161_v32, %v461_v2 }
  0x71   :  { %v405_v42 = vshll.u32 %v404_v34, 30  ;;  %vm478_vm9 = vcmp.lt.s32.totalorder %v1377_v19, 1  ;;  %v465_v47 = vor.u32 %v464_v21, %v463_v1  ;;  %v468_v57 = vor.u32 %v467_v27, %v466_v23 }
  0x72   :  { %v471_v3 = vor.u32 %v470_v60, %v469_v28  ;;  %v474_v4 = vor.u32 %v473_v36, %v472_v54  ;;  %v321_v25 = vmul.f32 %v320_v30, %v318_v40  ;;  %v477_v63 = vor.u32 %v476_v44, %v475_v38 }
  0x73   :  { %v1397_v61 = vsub.s32 %v402_v17, %v405_v42  ;;  %vm481_vm10 = vcmp.lt.s32.totalorder %v1377_v19, 4  ;;  %vm230_vm11 = vcmp.eq.s32.totalorder %v1371_v9, 0  ;;  %vm233_vm12 = vcmp.eq.s32.totalorder %v1371_v9, 2 }
  0x74   :  { %v331_v37 = vadd.s32 3, %v327_v35  ;;  %vm344_vm13 = vcmp.lt.s32.totalorder %v1189_v52, 0  ;;  %v462_v51 = vshrl.u32 %v1156_v16, %v461_v2  ;;  %vm480_vm14 = vcmp.lt.s32.totalorder %v1377_v19, 3 }
  0x75   :  { %vm229_vm15 = vcmp.lt.s32.totalorder %v1371_v9, 2  ;;  %v322_v0 = vxor.u32 2147483648, %v321_v25  ;;  %v408_v62 = vsub.s32 0, %v1397_v61  ;;  %v483_v39 = vsel %vm481_vm10, %v471_v3, 2102212464 }
  0x76   :  { %v553_v55 = vand.u32 2139095040, %v1180_v46  ;;  %vm226_vm0 = vweird.f32 %v1178_v45  ;;  %vm479_vm1 = vcmp.lt.s32.totalorder %v1377_v19, 2  ;;  %v486_v7 = vsel %vm478_vm9, %v465_v47, %v468_v57 }
  0x77   :  { %v487_v2 = vsel %vm481_vm10, %v474_v4, 920167782  ;;  %v491_v31 = vsel %vm481_vm10, %v477_v63, 1326507024  ;;  %v323_v10 = vsel %vm240_vm5, %v322_v0, %v321_v25  ;;  %v1002_v5 = vmin.u32 %v408_v62, %v1397_v61 }
  0x78   :  { %v488_v15 = vsel %vm480_vm14, %v471_v3, %v487_v2  ;;  %v490_v17 = vsel %vm478_vm9, %v468_v57, %v471_v3  ;;  %v326_v12 = vsel %vm1361_vm6, %v1182_v48, %v323_v10  ;;  %v482_v1 = vsel %vm478_vm9, %v462_v51, %v465_v47 }
  0x79   :  { %v484_v21 = vsel %vm480_vm14, %v468_v57, %v483_v39  ;;  %v492_v23 = vsel %vm480_vm14, %v474_v4, %v491_v31  ;;  %1081 = vcosq.f32 %v326_v12  ;;  %vm1436_vm2 = vcmp.le.f32.partialorder %v342_v13, 0.7853982 }
  0x7a   :  { %v410_v11 = vclz %v1002_v5  ;;  %v428_v26 = vsub.s32 4, %v404_v34  ;;  %v489_v59 = vsel %vm479_vm1, %v486_v7, %v488_v15  ;;  %1083 = vsinq.f32 %v326_v12 }
  0x7b   :  { %v398_v6 = vadd.s32 %v1349_v41, %v1343_v33  ;;  %v493_v27 = vsel %vm479_vm1, %v490_v17, %v492_v23  ;;  %v554_v28 = vshrl.u32 %v553_v55, 23  ;;  %v485_v13 = vsel %vm479_vm1, %v482_v1, %v484_v21 }
  0x7c   :  { %v1078_v60 = vpop.eup %1077  ;;  %v1003_v29 = vadd.s32 4294967294, %v410_v11  ;;  %v1449_v30 = vmul.u32.u64.low %v1354_v56, %v493_v27  ;;  %v1450_v35 = vmul.u32.u64.high %v1354_v56, %v493_v27, %v1449_v30  ;;  %v429_v42 = vsel %vm344_vm13, %v428_v26, %v404_v34 }
  0x7d   :  { %v1080_v54 = vpop.eup %1079  ;;  %v234_v36 = vxor.u32 2147483648, %v1078_v60  ;;  %v1453_v38 = vmul.u32.u64.low %v1354_v56, %v489_v59  ;;  %v1454_v40 = vmul.u32.u64.high %v1354_v56, %v489_v59, %v1453_v38  ;;  %v1009_v33 = vadd.s32 4294967169, %v554_v28 }
  0x7e   :  { %v231_v41 = vxor.u32 2147483648, %v1080_v54  ;;  %vm1004_vm3 = vcmp.lt.s32.totalorder %v1003_v29, 0  ;;  %v557_v19 = vand.u32 8388607, %v550_v58  ;;  %v501_v57 = vmul.u32 %v1354_v56, %v485_v13 }
  0x7f   :  { %v235_v44 = vsel %vm233_vm12, %v234_v36, %v1080_v54  ;;  %v413_v47 = vsel %vm1004_vm3, 0, %v1003_v29  ;;  %v560_v3 = vadd.s32 1, %v1009_v33  ;;  %v332_v0 = vand.u32 3, %v331_v37 }
  0x80   :  { %v232_v4 = vsel %vm230_vm11, %v1078_v60, %v231_v41  ;;  %v414_v25 = vsub.s32 32, %v413_v47  ;;  %v415_v63 = vshll.u32 %v1397_v61, %v413_v47  ;;  %v418_v51 = vsub.s32 4294967266, %v413_v47 }
  0x81   :  { %v236_v34 = vsel %vm229_vm15, %v232_v4, %v235_v44  ;;  %vm503_vm4 = vc.u32 %v1450_v35, %v1453_v38  ;;  %v504_v62 = vadd.s32 1, %v1454_v40  ;;  %vm561_vm5 = vcmp.gt.s32.totalorder %v560_v3, 0 }
  0x82   :  { %v237_v39 = vsel %vm226_vm0, nan, %v236_v34  ;;  %v416_v56 = vshrl.u32 %v398_v6, %v414_v25  ;;  %v419_v55 = vadd.s32 127, %v418_v51  ;;  %v431_v7 = vsel %vm1436_vm2, 0, %v429_v42 }
  0x83   :  { %v505_v61 = vsel %vm503_vm4, %v504_v62, %v1454_v40  ;;  %v558_v2 = vor.u32 8388608, %v557_v19  ;;  %v562_v31 = vsel %vm561_vm5, %v560_v3, 0  ;;  %966 = vst [vmem:[#allocation5] sm:$0xff] %v237_v39  ;;  %vm330_vm6 = vweird.f32 %v1182_v48 }
  0x84   :  { %v417_v9 = vor.u32 %v416_v56, %v415_v63  ;;  %v420_v37 = vshll.u32 %v419_v55, 23  ;;  %v506_v10 = vadd.s32 %v505_v61, %v501_v57  ;;  %vm333_vm7 = vcmp.lt.s32.totalorder %v332_v0, 2 }
  0x85   :  { %vm334_vm8 = vcmp.eq.s32.totalorder %v332_v0, 0  ;;  %vm337_vm9 = vcmp.eq.s32.totalorder %v332_v0, 2  ;;  %v564_v45 = vand.u32 31, %v562_v31  ;;  %v1476_v17 = vadd.s32 3, %v431_v7 }
  0x86   :  { %v421_v5 = vor.u32 4788187, %v420_v37  ;;  %v424_v15 = vcvt.s32.f32 %v417_v9  ;;  %v507_v12 = vadd.s32 536870912, %v506_v10  ;;  %v1082_v1 = vpop.eup %1081  ;;  %v1479_v21 = vadd.s32 %v1453_v38, %v1450_v35 }
  0x87   :  { %v565_v23 = vsub.s32 32, %v564_v45  ;;  %v1481_v11 = vshll.u32 %v558_v2, 8  ;;  %v654_v26 = vand.u32 2147483647, %v1184_v49  ;;  %v1084_v59 = vpop.eup %1083  ;;  %v338_v6 = vxor.u32 2147483648, %v1082_v1 }
  0x88   :  { %v422_v27 = vand.u32 2147483647, %v421_v5  ;;  %v508_v28 = vshrl.u32 %v507_v12, 30  ;;  %v563_v60 = vshrl.u32 %v562_v31, 5  ;;  %v335_v29 = vxor.u32 2147483648, %v1084_v59 }
  0x89   :  { %vm448_vm10 = vcmp.lt.s32.totalorder %v1201_v8, 0  ;;  %v567_v13 = vshll.u32 %v1156_v16, %v564_v45  ;;  %v568_v30 = vshrl.u32 %v1157_v18, %v565_v23  ;;  %v570_v35 = vshll.u32 %v1157_v18, %v564_v45 }
  0x8a   :  { %v339_v54 = vsel %vm337_vm9, %v338_v6, %v1084_v59  ;;  %v425_v36 = vmul.f32 %v424_v15, %v422_v27  ;;  %v509_v38 = vshll.u32 %v508_v28, 30  ;;  %v571_v40 = vshrl.u32 %v1158_v20, %v565_v23 }
  0x8b   :  { %v336_v33 = vsel %vm334_vm8, %v1082_v1, %v335_v29  ;;  %v573_v41 = vshll.u32 %v1158_v20, %v564_v45  ;;  %v574_v42 = vshrl.u32 %v1159_v22, %v565_v23  ;;  %v576_v19 = vshll.u32 %v1159_v22, %v564_v45 }
  0x8c   :  { %v340_v44 = vsel %vm333_vm7, %v336_v33, %v339_v54  ;;  %v426_v47 = vxor.u32 2147483648, %v425_v36  ;;  %v510_v57 = vsub.s32 %v506_v10, %v509_v38  ;;  %v566_v3 = vshrl.u32 %v1156_v16, %v565_v23 }
  0x8d   :  { %v341_v4 = vsel %vm330_vm6, nan, %v340_v44  ;;  %v532_v25 = vsub.s32 4, %v508_v28  ;;  %v569_v63 = vor.u32 %v568_v30, %v567_v13  ;;  %v577_v51 = vshrl.u32 %v1160_v24, %v565_v23 }
  0x8e   :  { %v427_v34 = vsel %vm344_vm13, %v426_v47, %v425_v36  ;;  %vm1503_vm11 = vcmp.le.f32.partialorder %v446_v14, 0.7853982  ;;  %v512_v0 = vsub.s32 0, %v510_v57  ;;  %v572_v39 = vor.u32 %v571_v40, %v570_v35  ;;  %967 = vst [vmem:[#allocation5 + $0x8] sm:$0xff] %v341_v4 }
  0x8f   :  { %v579_v56 = vshll.u32 %v1160_v24, %v564_v45  ;;  %v430_v48 = vsel %vm1436_vm2, %v1189_v52, %v427_v34  ;;  %v575_v55 = vor.u32 %v574_v42, %v573_v41  ;;  %v578_v7 = vor.u32 %v577_v51, %v576_v19 }
  0x90   :  { %v580_v61 = vshrl.u32 %v1161_v32, %v565_v23  ;;  %1085 = vcosq.f32 %v430_v48  ;;  %v1006_v2 = vmin.u32 %v512_v0, %v510_v57  ;;  %vm582_vm12 = vcmp.lt.s32.totalorder %v563_v60, 1 }
  0x91   :  { %v657_v14 = vand.u32 2139095040, %v1184_v49  ;;  %1087 = vsinq.f32 %v430_v48  ;;  %vm584_vm13 = vcmp.lt.s32.totalorder %v563_v60, 3  ;;  %vm585_vm14 = vcmp.lt.s32.totalorder %v563_v60, 4 }
  0x92   :  { %v581_v31 = vor.u32 %v580_v61, %v579_v56  ;;  %v514_v9 = vclz %v1006_v2  ;;  %v533_v37 = vsel %vm448_vm10, %v532_v25, %v508_v28  ;;  %vm583_vm15 = vcmp.lt.s32.totalorder %v563_v60, 2 }
  0x93   :  { %v586_v43 = vsel %vm582_vm12, %v566_v3, %v569_v63  ;;  %v587_v10 = vsel %vm585_vm14, %v575_v55, 2102212464  ;;  %v590_v45 = vsel %vm582_vm12, %v569_v63, %v572_v39  ;;  %v591_v5 = vsel %vm585_vm14, %v578_v7, 920167782 }
  0x94   :  { %v594_v15 = vsel %vm582_vm12, %v572_v39, %v575_v55  ;;  %v1007_v12 = vadd.s32 4294967294, %v514_v9  ;;  %v588_v1 = vsel %vm584_vm13, %v572_v39, %v587_v10  ;;  %v592_v23 = vsel %vm584_vm13, %v575_v55, %v591_v5 }
  0x95   :  { %v595_v59 = vsel %vm585_vm14, %v581_v31, 1326507024  ;;  %v589_v6 = vsel %vm583_vm15, %v586_v43, %v588_v1  ;;  %v593_v27 = vsel %vm583_vm15, %v590_v45, %v592_v23  ;;  %v658_v13 = vshrl.u32 %v657_v14, 23 }
  0x96   :  { %v596_v29 = vsel %vm584_vm13, %v578_v7, %v595_v59  ;;  %vm1008_vm0 = vcmp.lt.s32.totalorder %v1007_v12, 0  ;;  %v1519_v28 = vmul.u32.u64.low %v1481_v11, %v593_v27  ;;  %v1520_v35 = vmul.u32.u64.high %v1481_v11, %v593_v27, %v1519_v28 }
  0x97   :  { %v597_v30 = vsel %vm583_vm15, %v594_v15, %v596_v29  ;;  %v517_v54 = vsel %vm1008_vm0, 0, %v1007_v12  ;;  %v535_v36 = vsel %vm1503_vm11, 0, %v533_v37  ;;  %v1013_v42 = vadd.s32 4294967169, %v658_v13 }
  0x98   :  { %v1526_v38 = vmul.u32.u64.low %v1481_v11, %v597_v30  ;;  %v1527_v40 = vmul.u32.u64.high %v1481_v11, %v597_v30, %v1526_v38  ;;  %v518_v33 = vsub.s32 32, %v517_v54  ;;  %v519_v41 = vshll.u32 %v510_v57, %v517_v54 }
  0x99   :  { %v522_v60 = vsub.s32 4294967266, %v517_v54  ;;  %v436_v19 = vand.u32 3, %v1476_v17  ;;  %v605_v44 = vmul.u32 %v1481_v11, %v589_v6  ;;  %v608_v4 = vadd.s32 1, %v1520_v35 }
  0x9a   :  { %v520_v47 = vshrl.u32 %v1479_v21, %v518_v33  ;;  %v664_v25 = vadd.s32 1, %v1013_v42  ;;  %v539_v63 = vadd.s32 3, %v535_v36  ;;  %vm607_vm1 = vc.u32 %v1527_v40, %v1519_v28 }
  0x9b   :  { %v523_v3 = vadd.s32 127, %v522_v60  ;;  %v661_v51 = vand.u32 8388607, %v654_v26  ;;  %v609_v0 = vsel %vm607_vm1, %v608_v4, %v1520_v35  ;;  %vm434_vm3 = vweird.f32 %v1189_v52 }
  0x9c   :  { %v521_v57 = vor.u32 %v520_v47, %v519_v41  ;;  %vm665_vm2 = vcmp.gt.s32.totalorder %v664_v25, 0  ;;  %vm441_vm4 = vcmp.eq.s32.totalorder %v436_v19, 2  ;;  %v610_v21 = vadd.s32 %v609_v0, %v605_v44 }
  0x9d   :  { %v524_v34 = vshll.u32 %v523_v3, 23  ;;  %v1086_v17 = vpop.eup %1085  ;;  %v666_v11 = vsel %vm665_vm2, %v664_v25, 0  ;;  %vm438_vm5 = vcmp.eq.s32.totalorder %v436_v19, 0  ;;  %vm437_vm6 = vcmp.lt.s32.totalorder %v436_v19, 2 }
  0x9e   :  { %v1088_v39 = vpop.eup %1087  ;;  %v442_v56 = vxor.u32 2147483648, %v1086_v17  ;;  %v528_v55 = vcvt.s32.f32 %v521_v57  ;;  %v611_v61 = vadd.s32 536870912, %v610_v21  ;;  %v668_v2 = vand.u32 31, %v666_v11 }
  0x9f   :  { %v525_v48 = vor.u32 4788187, %v524_v34  ;;  %v439_v7 = vxor.u32 2147483648, %v1088_v39  ;;  %v1539_v9 = vand.u32 3, %v539_v63  ;;  %v662_v37 = vor.u32 8388608, %v661_v51 }
  0xa0   :  { %v443_v14 = vsel %vm441_vm4, %v442_v56, %v1088_v39  ;;  %v1541_v10 = vshrl.u32 %v611_v61, 30  ;;  %v669_v45 = vsub.s32 32, %v668_v2  ;;  %v761_v5 = vand.u32 2139095040, %v1186_v50 }
  0xa1   :  { %v526_v31 = vand.u32 2147483647, %v525_v48  ;;  %v440_v43 = vsel %vm438_vm5, %v1086_v17, %v439_v7  ;;  %v667_v1 = vshrl.u32 %v666_v11, 5  ;;  %v671_v23 = vshll.u32 %v1156_v16, %v668_v2 }
  0xa2   :  { %v444_v15 = vsel %vm437_vm6, %v440_v43, %v443_v14  ;;  %v613_v6 = vshll.u32 %v1541_v10, 30  ;;  %v674_v27 = vshll.u32 %v1157_v18, %v668_v2  ;;  %v677_v29 = vshll.u32 %v1158_v20, %v668_v2 }
  0xa3   :  { %v529_v12 = vmul.f32 %v528_v55, %v526_v31  ;;  %v445_v59 = vsel %vm434_vm3, nan, %v444_v15  ;;  %v672_v30 = vshrl.u32 %v1157_v18, %v669_v45  ;;  %v675_v35 = vshrl.u32 %v1158_v20, %v669_v45 }
  0xa4   :  { %v678_v54 = vshrl.u32 %v1159_v22, %v669_v45  ;;  %968 = vst [vmem:[#allocation5 + $0x10] sm:$0xff] %v445_v59  ;;  %v1553_v36 = vsub.s32 %v610_v21, %v613_v6  ;;  %v680_v38 = vshll.u32 %v1159_v22, %v668_v2  ;;  %v681_v52 = vshrl.u32 %v1160_v24, %v669_v45 }
  0xa5   :  { %v530_v13 = vxor.u32 2147483648, %v529_v12  ;;  %v762_v33 = vshrl.u32 %v761_v5, 23  ;;  %v670_v60 = vshrl.u32 %v1156_v16, %v669_v45  ;;  %v673_v42 = vor.u32 %v672_v30, %v671_v23 }
  0xa6   :  { %vm686_vm7 = vcmp.lt.s32.totalorder %v667_v1, 1  ;;  %v616_v44 = vsub.s32 0, %v1553_v36  ;;  %v676_v47 = vor.u32 %v675_v35, %v674_v27  ;;  %v679_v3 = vor.u32 %v678_v54, %v677_v29 }
  0xa7   :  { %v531_v41 = vsel %vm448_vm10, %v530_v13, %v529_v12  ;;  %v682_v4 = vor.u32 %v681_v52, %v680_v38  ;;  %v683_v25 = vshll.u32 %v1160_v24, %v668_v2  ;;  %v684_v63 = vshrl.u32 %v1161_v32, %v669_v45 }
  0xa8   :  { %v534_v19 = vsel %vm1503_vm11, %v1201_v8, %v531_v41  ;;  %v1010_v51 = vmin.u32 %v616_v44, %v1553_v36  ;;  %v702_v57 = vshll.u32 %v662_v37, 8  ;;  %v758_v34 = vand.u32 2147483647, %v1186_v50 }
  0xa9   :  { %1089 = vcosq.f32 %v534_v19  ;;  %v685_v0 = vor.u32 %v684_v63, %v683_v25  ;;  %vm688_vm8 = vcmp.lt.s32.totalorder %v667_v1, 3  ;;  %vm689_vm9 = vcmp.lt.s32.totalorder %v667_v1, 4 }
  0xaa   :  { %1091 = vsinq.f32 %v534_v19  ;;  %v1017_v62 = vadd.s32 4294967169, %v762_v33  ;;  %v618_v17 = vclz %v1010_v51  ;;  %vm687_vm10 = vcmp.lt.s32.totalorder %v667_v1, 2 }
  0xab   :  { %v690_v21 = vsel %vm686_vm7, %v670_v60, %v673_v42  ;;  %v694_v11 = vsel %vm686_vm7, %v673_v42, %v676_v47  ;;  %v691_v39 = vsel %vm689_vm9, %v679_v3, 2102212464  ;;  %v695_v56 = vsel %vm689_vm9, %v682_v4, 920167782 }
  0xac   :  { %v698_v48 = vsel %vm686_vm7, %v676_v47, %v679_v3  ;;  %v699_v55 = vsel %vm689_vm9, %v685_v0, 1326507024  ;;  %v1011_v7 = vadd.s32 4294967294, %v618_v17  ;;  %v692_v61 = vsel %vm688_vm8, %v676_v47, %v691_v39 }
  0xad   :  { %v696_v2 = vsel %vm688_vm8, %v679_v3, %v695_v56  ;;  %v700_v14 = vsel %vm688_vm8, %v682_v4, %v699_v55  ;;  %v606_v31 = vadd.s32 %v1519_v28, %v1527_v40  ;;  %v636_v37 = vsub.s32 4, %v1541_v10 }
  0xae   :  { %v697_v43 = vsel %vm687_vm10, %v694_v11, %v696_v2  ;;  %v701_v45 = vsel %vm687_vm10, %v698_v48, %v700_v14  ;;  %vm1012_vm11 = vcmp.lt.s32.totalorder %v1011_v7, 0  ;;  %v693_v5 = vsel %vm687_vm10, %v690_v21, %v692_v61 }
  0xaf   :  { %v1577_v15 = vmul.u32.u64.low %v702_v57, %v701_v45  ;;  %v1578_v12 = vmul.u32.u64.high %v702_v57, %v701_v45, %v1577_v15  ;;  %v621_v23 = vsel %vm1012_vm11, 0, %v1011_v7  ;;  %v768_v27 = vadd.s32 1, %v1017_v62 }
  0xb0   :  { %v1580_v59 = vmul.u32.u64.low %v702_v57, %v697_v43  ;;  %v1581_v6 = vmul.u32.u64.high %v702_v57, %v697_v43, %v1580_v59  ;;  %vm552_vm12 = vcmp.lt.s32.totalorder %v1180_v46, 0  ;;  %v622_v28 = vsub.s32 32, %v621_v23 }
  0xb1   :  { %v623_v40 = vshll.u32 %v1553_v36, %v621_v23  ;;  %v626_v29 = vsub.s32 4294967266, %v621_v23  ;;  %vm538_vm13 = vweird.f32 %v1201_v8  ;;  %vm1589_vm14 = vcmp.le.f32.partialorder %v550_v58, 0.7853982 }
  0xb2   :  { %v1596_v13 = vsel %vm552_vm12, %v636_v37, %v1541_v10  ;;  %vm769_vm15 = vcmp.gt.s32.totalorder %v768_v27, 0  ;;  %v624_v30 = vshrl.u32 %v606_v31, %v622_v28  ;;  %v709_v54 = vmul.u32 %v702_v57, %v693_v5 }
  0xb3   :  { %v627_v35 = vadd.s32 127, %v626_v29  ;;  %vm711_vm0 = vc.u32 %v1578_v12, %v1580_v59  ;;  %vm541_vm1 = vcmp.lt.s32.totalorder %v1539_v9, 2  ;;  %v712_v36 = vadd.s32 1, %v1581_v6 }
  0xb4   :  { %v765_v58 = vand.u32 8388607, %v758_v34  ;;  %v770_v38 = vsel %vm769_vm15, %v768_v27, 0  ;;  %vm545_vm2 = vcmp.eq.s32.totalorder %v1539_v9, 2  ;;  %v625_v10 = vor.u32 %v624_v30, %v623_v40 }
  0xb5   :  { %v628_v33 = vshll.u32 %v627_v35, 23  ;;  %v772_v41 = vand.u32 31, %v770_v38  ;;  %vm542_vm3 = vcmp.eq.s32.totalorder %v1539_v9, 0  ;;  %v639_v19 = vsel %vm1589_vm14, 0, %v1596_v13 }
  0xb6   :  { %v1090_v52 = vpop.eup %1089  ;;  %v713_v44 = vsel %vm711_vm0, %v712_v36, %v1581_v6  ;;  %v632_v4 = vcvt.s32.f32 %v625_v10  ;;  %v766_v51 = vor.u32 8388608, %v765_v58  ;;  %v865_v0 = vand.u32 2139095040, %v1191_v53 }
  0xb7   :  { %v1092_v60 = vpop.eup %1091  ;;  %v546_v42 = vxor.u32 2147483648, %v1090_v52  ;;  %v629_v3 = vor.u32 4788187, %v628_v33  ;;  %v714_v25 = vadd.s32 %v713_v44, %v709_v54  ;;  %v773_v57 = vsub.s32 32, %v772_v41 }
  0xb8   :  { %v543_v47 = vxor.u32 2147483648, %v1092_v60  ;;  %v771_v11 = vshrl.u32 %v770_v38, 5  ;;  %v775_v56 = vshll.u32 %v1156_v16, %v772_v41  ;;  %v778_v55 = vshll.u32 %v1157_v18, %v772_v41 }
  0xb9   :  { %v547_v63 = vsel %vm545_vm2, %v546_v42, %v1092_v60  ;;  %v630_v17 = vand.u32 2147483647, %v629_v3  ;;  %v715_v21 = vadd.s32 536870912, %v714_v25  ;;  %v776_v48 = vshrl.u32 %v1157_v18, %v773_v57 }
  0xba   :  { %v544_v62 = vsel %vm542_vm3, %v1090_v52, %v543_v47  ;;  %v779_v14 = vshrl.u32 %v1158_v20, %v773_v57  ;;  %v781_v31 = vshll.u32 %v1158_v20, %v772_v41  ;;  %v782_v37 = vshrl.u32 %v1159_v22, %v773_v57 }
  0xbb   :  { %v548_v39 = vsel %vm541_vm1, %v544_v62, %v547_v63  ;;  %v633_v61 = vmul.f32 %v632_v4, %v630_v17  ;;  %v1618_v2 = vshrl.u32 %v715_v21, 30  ;;  %v784_v9 = vshll.u32 %v1159_v22, %v772_v41 }
  0xbc   :  { %v549_v7 = vsel %vm538_vm13, nan, %v548_v39  ;;  %v785_v43 = vshrl.u32 %v1160_v24, %v773_v57  ;;  %v1626_v15 = vshll.u32 %v766_v51, 8  ;;  %v866_v8 = vshrl.u32 %v865_v0, 23 }
  0xbd   :  { %969 = vst [vmem:[#allocation5 + $0x18] sm:$0xff] %v549_v7  ;;  %v634_v45 = vxor.u32 2147483648, %v633_v61  ;;  %v717_v5 = vshll.u32 %v1618_v2, 30  ;;  %v774_v23 = vshrl.u32 %v1156_v16, %v773_v57  ;;  %v777_v6 = vor.u32 %v776_v48, %v775_v56 }
  0xbe   :  { %v787_v27 = vshll.u32 %v1160_v24, %v772_v41  ;;  %v788_v28 = vshrl.u32 %v1161_v32, %v773_v57  ;;  %v780_v13 = vor.u32 %v779_v14, %v778_v55  ;;  %v786_v30 = vor.u32 %v785_v43, %v784_v9 }
  0xbf   :  { %v635_v40 = vsel %vm552_vm12, %v634_v45, %v633_v61  ;;  %v1633_v29 = vsub.s32 %v714_v25, %v717_v5  ;;  %v783_v54 = vor.u32 %v782_v37, %v781_v31  ;;  %vm790_vm4 = vcmp.lt.s32.totalorder %v771_v11, 1 }
  0xc0   :  { %v638_v35 = vsel %vm1589_vm14, %v1180_v46, %v635_v40  ;;  %v789_v36 = vor.u32 %v788_v28, %v787_v27  ;;  %vm792_vm5 = vcmp.lt.s32.totalorder %v771_v11, 3  ;;  %vm793_vm6 = vcmp.lt.s32.totalorder %v771_v11, 4 }
  0xc1   :  { %1093 = vcosq.f32 %v638_v35  ;;  %v720_v58 = vsub.s32 0, %v1633_v29  ;;  %vm791_vm7 = vcmp.lt.s32.totalorder %v771_v11, 2  ;;  %v794_v38 = vsel %vm790_vm4, %v774_v23, %v777_v6 }
  0xc2   :  { %1095 = vsinq.f32 %v638_v35  ;;  %v795_v52 = vsel %vm793_vm6, %v783_v54, 2102212464  ;;  %v798_v41 = vsel %vm790_vm4, %v777_v6, %v780_v13  ;;  %v799_v60 = vsel %vm793_vm6, %v786_v30, 920167782 }
  0xc3   :  { %v1014_v10 = vmin.u32 %v720_v58, %v1633_v29  ;;  %v796_v33 = vsel %vm792_vm5, %v780_v13, %v795_v52  ;;  %v800_v1 = vsel %vm792_vm5, %v783_v54, %v799_v60  ;;  %v802_v42 = vsel %vm790_vm4, %v780_v13, %v783_v54 }
  0xc4   :  { %v803_v44 = vsel %vm793_vm6, %v789_v36, 1326507024  ;;  %v643_v47 = vadd.s32 3, %v639_v19  ;;  %v797_v4 = vsel %vm791_vm7, %v794_v38, %v796_v33  ;;  %v801_v25 = vsel %vm791_vm7, %v798_v41, %v800_v1 }
  0xc5   :  { %v722_v3 = vclz %v1014_v10  ;;  %v804_v63 = vsel %vm792_vm5, %v786_v30, %v803_v44  ;;  %v1021_v51 = vadd.s32 4294967169, %v866_v8  ;;  %v710_v56 = vadd.s32 %v1580_v59, %v1578_v12 }
  0xc6   :  { %v805_v0 = vsel %vm791_vm7, %v802_v42, %v804_v63  ;;  %v1647_v62 = vmul.u32.u64.low %v1626_v15, %v801_v25  ;;  %v1648_v17 = vmul.u32.u64.high %v1626_v15, %v801_v25, %v1647_v62  ;;  %v862_v48 = vand.u32 2147483647, %v1191_v53 }
  0xc7   :  { %v1015_v57 = vadd.s32 4294967294, %v722_v3  ;;  %v1652_v21 = vmul.u32.u64.low %v1626_v15, %v805_v0  ;;  %v1653_v39 = vmul.u32.u64.high %v1626_v15, %v805_v0, %v1652_v21  ;;  %v872_v19 = vadd.s32 1, %v1021_v51 }
  0xc8   :  { %v644_v55 = vand.u32 3, %v643_v47  ;;  %v813_v11 = vmul.u32 %v1626_v15, %v797_v4  ;;  %v816_v37 = vadd.s32 1, %v1648_v17  ;;  %vm642_vm10 = vweird.f32 %v1180_v46 }
  0xc9   :  { %vm1016_vm8 = vcmp.lt.s32.totalorder %v1015_v57, 0  ;;  %vm873_vm9 = vcmp.gt.s32.totalorder %v872_v19, 0  ;;  %vm656_vm11 = vcmp.lt.s32.totalorder %v1184_v49, 0  ;;  %vm815_vm12 = vc.u32 %v1653_v39, %v1647_v62 }
  0xca   :  { %v725_v7 = vsel %vm1016_vm8, 0, %v1015_v57  ;;  %v874_v12 = vsel %vm873_vm9, %v872_v19, 0  ;;  %v817_v43 = vsel %vm815_vm12, %v816_v37, %v1648_v17  ;;  %v869_v45 = vand.u32 8388607, %v862_v48 }
  0xcb   :  { %v726_v61 = vsub.s32 32, %v725_v7  ;;  %v727_v14 = vshll.u32 %v1633_v29, %v725_v7  ;;  %v730_v31 = vsub.s32 4294967266, %v725_v7  ;;  %vm645_vm13 = vcmp.lt.s32.totalorder %v644_v55, 2 }
  0xcc   :  { %vm649_vm14 = vcmp.eq.s32.totalorder %v644_v55, 2  ;;  %v818_v15 = vadd.s32 %v817_v43, %v813_v11  ;;  %v876_v8 = vand.u32 31, %v874_v12  ;;  %vm646_vm15 = vcmp.eq.s32.totalorder %v644_v55, 0 }
  0xcd   :  { %v728_v59 = vshrl.u32 %v710_v56, %v726_v61  ;;  %v731_v9 = vadd.s32 127, %v730_v31  ;;  %vm1670_vm0 = vcmp.le.f32.partialorder %v654_v26, 0.7853982  ;;  %v740_v13 = vsub.s32 4, %v1618_v2 }
  0xce   :  { %v1094_v5 = vpop.eup %1093  ;;  %v819_v30 = vadd.s32 536870912, %v818_v15  ;;  %v877_v35 = vsub.s32 32, %v876_v8  ;;  %v870_v38 = vor.u32 8388608, %v869_v45  ;;  %v879_v33 = vshll.u32 %v1156_v16, %v876_v8 }
  0xcf   :  { %v1096_v23 = vpop.eup %1095  ;;  %v650_v6 = vxor.u32 2147483648, %v1094_v5  ;;  %v729_v28 = vor.u32 %v728_v59, %v727_v14  ;;  %v732_v40 = vshll.u32 %v731_v9, 23  ;;  %v882_v26 = vshll.u32 %v1157_v18, %v876_v8 }
  0xd0   :  { %v647_v29 = vxor.u32 2147483648, %v1096_v23  ;;  %v1675_v10 = vshrl.u32 %v819_v30, 30  ;;  %v880_v1 = vshrl.u32 %v1157_v18, %v877_v35  ;;  %v883_v42 = vshrl.u32 %v1158_v20, %v877_v35 }
  0xd1   :  { %v651_v54 = vsel %vm649_vm14, %v650_v6, %v1096_v23  ;;  %v733_v36 = vor.u32 4788187, %v732_v40  ;;  %v736_v58 = vcvt.s32.f32 %v729_v28  ;;  %v741_v47 = vsel %vm656_vm11, %v740_v13, %v1618_v2 }
  0xd2   :  { %v648_v52 = vsel %vm646_vm15, %v1094_v5, %v647_v29  ;;  %v821_v3 = vshll.u32 %v1675_v10, 30  ;;  %v875_v4 = vshrl.u32 %v874_v12, 5  ;;  %v885_v63 = vshll.u32 %v1158_v20, %v876_v8 }
  0xd3   :  { %v652_v41 = vsel %vm645_vm13, %v648_v52, %v651_v54  ;;  %v734_v60 = vand.u32 2147483647, %v733_v36  ;;  %v886_v51 = vshrl.u32 %v1159_v22, %v877_v35  ;;  %v888_v57 = vshll.u32 %v1159_v22, %v876_v8 }
  0xd4   :  { %v653_v44 = vsel %vm642_vm10, nan, %v652_v41  ;;  %v822_v18 = vsub.s32 %v818_v15, %v821_v3  ;;  %v889_v0 = vshrl.u32 %v1160_v24, %v877_v35  ;;  %v891_v46 = vshll.u32 %v1160_v24, %v876_v8 }
  0xd5   :  { %v737_v25 = vmul.f32 %v736_v58, %v734_v60  ;;  %970 = vst [vmem:[#allocation5 + $0x20] sm:$0xff] %v653_v44  ;;  %v910_v17 = vshll.u32 %v870_v38, 8  ;;  %v881_v19 = vor.u32 %v880_v1, %v879_v33  ;;  %v884_v2 = vor.u32 %v883_v42, %v882_v26 }
  0xd6   :  { %v892_v56 = vshrl.u32 %v1161_v32, %v877_v35  ;;  %v824_v55 = vsub.s32 0, %v822_v18  ;;  %v878_v7 = vshrl.u32 %v1156_v16, %v877_v35  ;;  %v890_v20 = vor.u32 %v889_v0, %v888_v57 }
  0xd7   :  { %v738_v21 = vxor.u32 2147483648, %v737_v25  ;;  %vm894_vm1 = vcmp.lt.s32.totalorder %v875_v4, 1  ;;  %v887_v11 = vor.u32 %v886_v51, %v885_v63  ;;  %vm895_vm2 = vcmp.lt.s32.totalorder %v875_v4, 2 }
  0xd8   :  { %vm897_vm3 = vcmp.lt.s32.totalorder %v875_v4, 4  ;;  %v1018_v61 = vmin.u32 %v824_v55, %v822_v18  ;;  %v893_v14 = vor.u32 %v892_v56, %v891_v46  ;;  %vm896_vm4 = vcmp.lt.s32.totalorder %v875_v4, 3 }
  0xd9   :  { %v739_v22 = vsel %vm656_vm11, %v738_v21, %v737_v25  ;;  %v899_v32 = vsel %vm897_vm3, %v887_v11, 2102212464  ;;  %v902_v16 = vsel %vm894_vm1, %v881_v19, %v884_v2  ;;  %v903_v31 = vsel %vm897_vm3, %v890_v20, 920167782 }
  0xda   :  { %v742_v24 = vsel %vm1670_vm0, %v1184_v49, %v739_v22  ;;  %v743_v37 = vsel %vm1670_vm0, 0, %v741_v47  ;;  %v826_v12 = vclz %v1018_v61  ;;  %v898_v59 = vsel %vm894_vm1, %v878_v7, %v881_v19 }
  0xdb   :  { %1097 = vcosq.f32 %v742_v24  ;;  %v900_v9 = vsel %vm896_vm4, %v884_v2, %v899_v32  ;;  %v904_v43 = vsel %vm896_vm4, %v887_v11, %v903_v31  ;;  %v906_v45 = vsel %vm894_vm1, %v884_v2, %v887_v11 }
  0xdc   :  { %1099 = vsinq.f32 %v742_v24  ;;  %v1019_v5 = vadd.s32 4294967294, %v826_v12  ;;  %v905_v15 = vsel %vm895_vm2, %v902_v16, %v904_v43  ;;  %v907_v8 = vsel %vm897_vm3, %v893_v14, 1326507024 }
  0xdd   :  { %v747_v23 = vadd.s32 3, %v743_v37  ;;  %v908_v6 = vsel %vm896_vm4, %v890_v20, %v907_v8  ;;  %v1712_v27 = vmul.u32.u64.low %v910_v17, %v905_v15  ;;  %v1713_v28 = vmul.u32.u64.high %v910_v17, %v905_v15, %v1712_v27 }
  0xde   :  { %v814_v40 = vadd.s32 %v1647_v62, %v1653_v39  ;;  %vm1020_vm5 = vcmp.lt.s32.totalorder %v1019_v5, 0  ;;  %v901_v29 = vsel %vm895_vm2, %v898_v59, %v900_v9  ;;  %v909_v13 = vsel %vm895_vm2, %v906_v45, %v908_v6 }
  0xdf   :  { %v829_v30 = vsel %vm1020_vm5, 0, %v1019_v5  ;;  %v1719_v35 = vmul.u32.u64.low %v910_v17, %v909_v13  ;;  %v1720_v54 = vmul.u32.u64.high %v910_v17, %v909_v13, %v1719_v35  ;;  %v917_v52 = vmul.u32 %v910_v17, %v901_v29 }
  0xe0   :  { %v830_v36 = vsub.s32 32, %v829_v30  ;;  %v831_v58 = vshll.u32 %v822_v18, %v829_v30  ;;  %v834_v38 = vsub.s32 4294967266, %v829_v30  ;;  %v920_v33 = vadd.s32 1, %v1713_v28 }
  0xe1   :  { %v748_v26 = vand.u32 3, %v747_v23  ;;  %vm919_vm6 = vc.u32 %v1720_v54, %v1712_v27  ;;  %vm746_vm10 = vweird.f32 %v1184_v49  ;;  %vm760_vm11 = vcmp.lt.s32.totalorder %v1186_v50, 0 }
  0xe2   :  { %v832_v41 = vshrl.u32 %v814_v40, %v830_v36  ;;  %v835_v60 = vadd.s32 127, %v834_v38  ;;  %v921_v1 = vsel %vm919_vm6, %v920_v33, %v1713_v28  ;;  %v844_v19 = vsub.s32 4, %v1675_v10 }
  0xe3   :  { %v922_v42 = vadd.s32 %v921_v1, %v917_v52  ;;  %vm753_vm7 = vcmp.eq.s32.totalorder %v748_v26, 2  ;;  %vm750_vm8 = vcmp.eq.s32.totalorder %v748_v26, 0  ;;  %vm749_vm9 = vcmp.lt.s32.totalorder %v748_v26, 2 }
  0xe4   :  { %v833_v62 = vor.u32 %v832_v41, %v831_v58  ;;  %v836_v39 = vshll.u32 %v835_v60, 23  ;;  %vm759_vm12 = vcmp.le.f32.partialorder %v758_v34, 0.7853982  ;;  %v845_v49 = vsel %vm760_vm11, %v844_v19, %v1675_v10 }
  0xe5   :  { %v923_v63 = vadd.s32 536870912, %v922_v42  ;;  %v847_v61 = vsel %vm759_vm12, 0, %v845_v49  ;;  %v918_v31 = vadd.s32 %v1712_v27, %v1720_v54  ;;  %vm850_vm1 = vweird.f32 %v1186_v50 }
  0xe6   :  { %v837_v47 = vor.u32 4788187, %v836_v39  ;;  %v840_v3 = vcvt.s32.f32 %v833_v62  ;;  %v851_v32 = vadd.s32 3, %v847_v61  ;;  %vm864_vm2 = vcmp.lt.s32.totalorder %v1191_v53, 0 }
  0xe7   :  { %v924_v0 = vshrl.u32 %v923_v63, 30  ;;  %vm863_vm3 = vcmp.le.f32.partialorder %v862_v48, 0.7853982 }
  0xe8   :  { %v1098_v44 = vpop.eup %1097  ;;  %v838_v57 = vand.u32 2147483647, %v837_v47  ;;  %v852_v37 = vand.u32 3, %v851_v32 }
  0xe9   :  { %v1100_v4 = vpop.eup %1099  ;;  %v754_v25 = vxor.u32 2147483648, %v1098_v44  ;;  %v925_v2 = vshll.u32 %v924_v0, 30  ;;  %v948_v36 = vsub.s32 4, %v924_v0 }
  0xea   :  { %v751_v51 = vxor.u32 2147483648, %v1100_v4  ;;  %v841_v17 = vmul.f32 %v840_v3, %v838_v57  ;;  %vm857_vm14 = vcmp.eq.s32.totalorder %v852_v37, 2  ;;  %vm854_vm15 = vcmp.eq.s32.totalorder %v852_v37, 0 }
  0xeb   :  { %v755_v18 = vsel %vm753_vm7, %v754_v25, %v1100_v4  ;;  %v926_v7 = vsub.s32 %v922_v42, %v925_v2  ;;  %vm853_vm0 = vcmp.lt.s32.totalorder %v852_v37, 2  ;;  %v949_v52 = vsel %vm864_vm2, %v948_v36, %v924_v0 }
  0xec   :  { %v752_v46 = vsel %vm750_vm8, %v1098_v44, %v751_v51  ;;  %v842_v55 = vxor.u32 2147483648, %v841_v17  ;;  %vm954_vm7 = vweird.f32 %v1191_v53 }
  0xed   :  { %v756_v21 = vsel %vm749_vm9, %v752_v46, %v755_v18  ;;  %v928_v11 = vsub.s32 0, %v926_v7 }
  0xee   :  { %v757_v56 = vsel %vm746_vm10, nan, %v756_v21  ;;  %v843_v20 = vsel %vm760_vm11, %v842_v55, %v841_v17 }
  0xef   :  { %971 = vst [vmem:[#allocation5 + $0x28] sm:$0xff] %v757_v56  ;;  %v846_v22 = vsel %vm759_vm12, %v1186_v50, %v843_v20  ;;  %v1022_v24 = vmin.u32 %v928_v11, %v926_v7  ;;  %v951_v50 = vsel %vm863_vm3, 0, %v949_v52 }
  0xf0   :  { %1101 = vcosq.f32 %v846_v22  ;;  %v955_v26 = vadd.s32 3, %v951_v50 }
  0xf1   :  { %1103 = vsinq.f32 %v846_v22  ;;  %v930_v14 = vclz %v1022_v24 }
  0xf2   :  { %v956_v41 = vand.u32 3, %v955_v26 }
  0xf3   :  { %v1023_v16 = vadd.s32 4294967294, %v930_v14 }
  0xf4   :  { %vm961_vm4 = vcmp.eq.s32.totalorder %v956_v41, 2  ;;  %vm958_vm5 = vcmp.eq.s32.totalorder %v956_v41, 0  ;;  %vm957_vm6 = vcmp.lt.s32.totalorder %v956_v41, 2 }
  0xf5   :  { %vm1024_vm13 = vcmp.lt.s32.totalorder %v1023_v16, 0 }
  0xf6   :  { %v933_v34 = vsel %vm1024_vm13, 0, %v1023_v16 }
  0xf7   :  { %v934_v12 = vsub.s32 32, %v933_v34  ;;  %v935_v59 = vshll.u32 %v926_v7, %v933_v34  ;;  %v938_v9 = vsub.s32 4294967266, %v933_v34 }
  0xf9   :  { %v936_v43 = vshrl.u32 %v918_v31, %v934_v12  ;;  %v939_v10 = vadd.s32 127, %v938_v9 }
  0xfb   :  { %v937_v5 = vor.u32 %v936_v43, %v935_v59  ;;  %v940_v15 = vshll.u32 %v939_v10, 23 }
  0xfd   :  { %v1102_v45 = vpop.eup %1101  ;;  %v941_v28 = vor.u32 4788187, %v940_v15  ;;  %v944_v40 = vcvt.s32.f32 %v937_v5 }
  0xfe   :  { %v1104_v8 = vpop.eup %1103  ;;  %v858_v23 = vxor.u32 2147483648, %v1102_v45 }
  0xff   :  { %v855_v6 = vxor.u32 2147483648, %v1104_v8  ;;  %v942_v13 = vand.u32 2147483647, %v941_v28 }
 0x100   :  { %v859_v27 = vsel %vm857_vm14, %v858_v23, %v1104_v8 }
 0x101   :  { %v856_v29 = vsel %vm854_vm15, %v1102_v45, %v855_v6  ;;  %v945_v54 = vmul.f32 %v944_v40, %v942_v13 }
 0x102   :  { %v860_v30 = vsel %vm853_vm0, %v856_v29, %v859_v27 }
 0x103   :  { %v861_v35 = vsel %vm850_vm1, nan, %v860_v30  ;;  %v946_v58 = vxor.u32 2147483648, %v945_v54 }
 0x104   :  { %972 = vst [vmem:[#allocation5 + $0x30] sm:$0xff] %v861_v35 }
 0x105   :  { %v947_v38 = vsel %vm864_vm2, %v946_v58, %v945_v54 }
 0x106   :  { %v950_v33 = vsel %vm863_vm3, %v1191_v53, %v947_v38 }
 0x107   :  { %1105 = vcosq.f32 %v950_v33 }
 0x108   :  { %1107 = vsinq.f32 %v950_v33 }
 0x114   :  { %v1106_v60 = vpop.eup %1105 }
 0x115   :  { %v1108_v62 = vpop.eup %1107  ;;  %v962_v39 = vxor.u32 2147483648, %v1106_v60 }
 0x116   :  { %v959_v1 = vxor.u32 2147483648, %v1108_v62 }
 0x117   :  { %v963_v48 = vsel %vm961_vm4, %v962_v39, %v1108_v62 }
 0x118   :  { %v960_v42 = vsel %vm958_vm5, %v1106_v60, %v959_v1 }
 0x119   :  { %v964_v44 = vsel %vm957_vm6, %v960_v42, %v963_v48 }
 0x11a   :  { %v965_v47 = vsel %vm954_vm7, nan, %v964_v44 }
 0x11b   :  { %973 = vst [vmem:[#allocation5 + $0x38] sm:$0xff] %v965_v47 }
 0x11c   :  { %1140 = shalt.err (!%p1137_p9)
}
 0x11d   :  { %s1163_s15 = smov 128   ;;  %s1164_s16 = smov 8  }
 0x11e   :  { %985 = dma.vmem_to_hbm [thread:$0]  %s980_s13, 1024, %s1743_s1, [#allocation4], %s1163_s15, %s1163_s15, %s1164_s16  }
 0x11f   :  { %1151 = dma.done.wait [#allocation4], 1024  }
 0x120   :  { %1152 = vsyncadd [#allocation4], 4294966272 }
 0x121   :  { %989 = vsyncpa [#allocation3], 1 }
 0x122   :  { %990 = vsyncpa [#allocation4], 1 }

</bundles_post_ra>
